<compile_context>
chip_gen: v5e
topology: v5e:2x2
jax: 0.10.0
libtpu: 0.0.40
codegen_flags: <defaults>
</compile_context>

<pallas_src>
import functools

import jax
import jax.numpy as jnp
from jax.experimental import pallas as pl
from jax.experimental.pallas import tpu as pltpu


# ----------------------------------------------------------------------------
# Pallas kernel: fused output head (one invocation covers the whole batch)
# ----------------------------------------------------------------------------
def _fused_head_kernel(dec_ref, wp_ref, cw_ref, idx_ref, prob_ref, wg_ref,
                       out_ref, *, B, T, S, K):
    # dec_ref : (BTp, D)   bf16  decoder hidden states, batch*time flattened
    # wp_ref  : (D, V)     bf16  projection weight
    # cw_ref  : (B, T, S)  bf16  copy-attention weights
    # idx_ref : (B, K*S)   i32   scatter indices (K-major flattened)
    # prob_ref: (B, K*S)   f32   scatter values  (K-major flattened)
    # wg_ref  : (1, D)     f32   copy-gate weight
    # out_ref : (BTp, V)   f32   final_scores (rows >= B*T are padding)
    V = wp_ref.shape[1]
    KS = idx_ref.shape[1]
    BTp = out_ref.shape[0]
    BT = B * T

    dec_bf = dec_ref[...]                                     # (BTp, D) bf16
    wp = wp_ref[...]                                          # (D, V)   bf16

    # --- projection + softmax over the vocab (bf16 MXU, f32 accumulate) -----
    logits = jnp.dot(dec_bf, wp, preferred_element_type=jnp.float32)  # (BTp, V)
    m = jnp.max(logits, axis=-1, keepdims=True)
    e = jnp.exp(logits - m)
    denom = jnp.sum(e, axis=-1, keepdims=True)
    dec_probs = e * pl.reciprocal(denom, approx=True)         # (BTp, V)

    # --- copy gate p_range = sigmoid(dec . w_gate), computed in-kernel ------
    dec_f = dec_bf.astype(jnp.float32)
    g = jnp.sum(dec_f * wg_ref[...], axis=-1, keepdims=True)  # (BTp, 1)
    p = 1.0 / (1.0 + jnp.exp(-g))

    # --- copy scores: scatter_add_ fused into one bf16 one-hot matmul -------
    #   A[b, t, k*S + s]      = copy_weight[b, t, s] * probs[b, s, k]
    #   onehot[b, k*S + s, v] = [idxes[b, s, k] == v]
    #   trans[b, t, v]        = sum_x A[b, t, x] * onehot[b, x, v]
    cw = cw_ref[...].astype(jnp.float32)                      # (B, T, S)
    cw_k = jnp.concatenate([cw] * K, axis=2)                  # (B, T, K*S) k-major
    a = (cw_k * prob_ref[...][:, None, :]).astype(jnp.bfloat16)

    iota_v = jax.lax.broadcasted_iota(jnp.int32, (B, KS, V), 2)
    onehot = (iota_v == idx_ref[...][:, :, None]).astype(jnp.bfloat16)
    trans = jnp.einsum('btx,bxv->btv', a, onehot,
                       preferred_element_type=jnp.float32)    # (B, T, V)
    trans = trans.reshape(BT, V)
    if BTp != BT:                                             # static padding rows
        trans = jnp.concatenate(
            [trans, jnp.zeros((BTp - BT, V), jnp.float32)], axis=0)

    # --- log-mixture (eps guards degenerate all-zero rows; values unchanged) -
    mix = p * trans + (1.0 - p) * dec_probs
    out_ref[...] = jnp.log(mix + 1e-12)


def fused_output_head(dec_outputs, w_proj, copy_weight, idxes, probs, w_gate):
    B, T, D = dec_outputs.shape
    V = w_proj.shape[1]
    S, K = idxes.shape[1], idxes.shape[2]
    assert V % 128 == 0, "pad tgt vocab to a multiple of 128 (lane-dense output)"

    BT = B * T
    BTp = ((BT + 7) // 8) * 8          # sublane-align the flattened row dim

    dec2 = dec_outputs.reshape(BT, D).astype(jnp.bfloat16)
    if BTp != BT:
        dec2 = jnp.pad(dec2, ((0, BTp - BT), (0, 0)))

    wp = w_proj.astype(jnp.bfloat16)
    cw = copy_weight.astype(jnp.bfloat16)
    # lane-dense, K-major flattening of the scatter candidates: (B, S, K) -> (B, K*S)
    idx_km = idxes.transpose(0, 2, 1).reshape(B, K * S).astype(jnp.int32)
    prob_km = probs.transpose(0, 2, 1).reshape(B, K * S).astype(jnp.float32)
    wg_row = w_gate.reshape(1, D).astype(jnp.float32)

    kernel = functools.partial(_fused_head_kernel, B=B, T=T, S=S, K=K)

    grid_spec = pltpu.PrefetchScalarGridSpec(
        num_scalar_prefetch=0,
        grid=(1,),                      # single step: no per-batch pipeline overhead
        in_specs=[
            pl.BlockSpec((BTp, D), lambda i: (0, 0)),
            pl.BlockSpec((D, V), lambda i: (0, 0)),
            pl.BlockSpec((B, T, S), lambda i: (0, 0, 0)),
            pl.BlockSpec((B, K * S), lambda i: (0, 0)),
            pl.BlockSpec((B, K * S), lambda i: (0, 0)),
            pl.BlockSpec((1, D), lambda i: (0, 0)),
        ],
        out_specs=pl.BlockSpec((BTp, V), lambda i: (0, 0)),
    )
    out = pl.pallas_call(
        kernel,
        out_shape=jax.ShapeDtypeStruct((BTp, V), jnp.float32),
        grid_spec=grid_spec,
        compiler_params=pltpu.CompilerParams(
            dimension_semantics=("arbitrary",)),
    )(dec2, wp, cw, idx_km, prob_km, wg_row)
    return out[:BT].reshape(B, T, V)


# ----------------------------------------------------------------------------
# Pure-JAX reference for the fused head (used only for the in-script check).
# Mirrors the wrapper's bf16 input casts; the scatter_add_ / matmul / mixture
# follow the original PyTorch math in f32.
# ----------------------------------------------------------------------------
def reference_output_head(dec_outputs, w_proj, copy_weight, idxes, probs,
                          w_gate):
    B, T, D = dec_outputs.shape
    V = w_proj.shape[1]
    S = idxes.shape[1]
    dec = dec_outputs.astype(jnp.bfloat16).astype(jnp.float32)
    wp = w_proj.astype(jnp.bfloat16).astype(jnp.float32)
    logits = jnp.einsum('btd,dv->btv', dec, wp)
    dec_probs = jax.nn.softmax(logits, axis=-1)
    p = jax.nn.sigmoid(
        jnp.einsum('btd,d->bt', dec, w_gate.reshape(-1)))[..., None]
    cw = copy_weight.astype(jnp.bfloat16).astype(jnp.float32)
    tmp = jnp.zeros((B, S, V), jnp.float32)
    b_idx = jnp.arange(B)[:, None, None]
    s_idx = jnp.arange(S)[None, :, None]
    tmp = tmp.at[b_idx, s_idx, idxes].add(probs)              # scatter_add_
    trans = jnp.einsum('bts,bsv->btv', cw, tmp)
    return jnp.log(p * trans + (1.0 - p) * dec_probs + 1e-12)


# ----------------------------------------------------------------------------
# Deterministic stand-ins for the sub-modules (their source is not in this
# file).  They only provide tensors of the right shapes/semantics for the
# top-level forward above.
# TODO(synk): GraphEncoder / Encoder / GraphDecoder definitions are not part
#             of newmodel3.py's provided code; simplified JAX stand-ins used.
# ----------------------------------------------------------------------------
def graph_encoder(enc_inputs, en_adjs, src_emb, wg):
    node = jnp.mean(src_emb[enc_inputs], axis=2)                 # [B, N, D]
    node = jnp.einsum('bij,bjd->bid', en_adjs, node)             # graph mix
    return jnp.tanh(node @ wg)                                   # [B, N, D]


def cpt_encoder(cpt_inputs, src_emb, wc):
    h = src_emb[cpt_inputs]                                      # [B, S, D]
    return jnp.tanh(h @ wc), None


def graph_decoder(dec_inputs, enc_outputs, cpt_outputs, tgt_emb, wd):
    h = tgt_emb[dec_inputs]                                      # [B, T, D]
    D = h.shape[-1]
    scores = jnp.einsum('btd,bsd->bts', h, cpt_outputs) / jnp.sqrt(
        jnp.float32(D))
    weight = jax.nn.softmax(scores, axis=-1)                     # [B, T, S]
    ctx = jnp.einsum('bts,bsd->btd', weight, cpt_outputs)
    dec_outputs = jnp.tanh((h + ctx) @ wd)                       # [B, T, D]
    return dec_outputs, weight


# ----------------------------------------------------------------------------
# Full forward (mirrors GraphTransformer.forward)
# ----------------------------------------------------------------------------
def graph_transformer_forward(params, enc_inputs, en_adjs, cpt_inputs,
                              dec_inputs, probs, idxes, use_pallas=True):
    dec_inputs = dec_inputs[:, :-1]
    enc_outputs = graph_encoder(enc_inputs, en_adjs, params['src_emb'],
                                params['wg'])
    cpt_outputs, _ = cpt_encoder(cpt_inputs, params['src_emb'], params['wc'])
    dec_outputs, weight = graph_decoder(dec_inputs, enc_outputs, cpt_outputs,
                                        params['tgt_emb'], params['wd'])
    head = fused_output_head if use_pallas else reference_output_head
    # Fused Pallas hot path: projection+softmax, copy gate, scatter_add as a
    # one-hot matmul, copy matmul, log-mixture.
    final_scores = head(dec_outputs, params['w_proj'], weight, idxes, probs,
                        params['w_gate'])
    return final_scores


# ----------------------------------------------------------------------------
if __name__ == "__main__":
    B = 2           # batch
    N_NODES = 4     # graph nodes
    N_WORDS = 6     # words per node
    S = 8           # src_len (cpt)
    T1 = 9          # tgt_len (decoder drops last -> T = 8)
    T = T1 - 1
    D = 32          # embedding_dim
    SRC_V = 64      # src vocab
    TGT_V = 128     # tgt vocab (multiple of 128 -> lane-dense output)
    K = 4           # scatter candidates per source position

    key = jax.random.PRNGKey(0)
    keys = jax.random.split(key, 16)

    params = {
        'src_emb': 0.1 * jax.random.normal(keys[0], (SRC_V, D), jnp.float32),
        'tgt_emb': 0.1 * jax.random.normal(keys[1], (TGT_V, D), jnp.float32),
        'wg':      0.1 * jax.random.normal(keys[2], (D, D), jnp.float32),
        'wc':      0.1 * jax.random.normal(keys[3], (D, D), jnp.float32),
        'wd':      0.1 * jax.random.normal(keys[4], (D, D), jnp.float32),
        'w_gate':  0.1 * jax.random.normal(keys[5], (D, 1), jnp.float32),
        # nn.Linear(embedding_dim, tgt_vocab_size, bias=False) -> (D, V)
        'w_proj':  0.1 * jax.random.normal(keys[6], (D, TGT_V), jnp.float32),
    }

    enc_inputs = jax.random.randint(keys[7], (B, N_NODES, N_WORDS), 0, SRC_V)
    en_adjs = (jax.random.uniform(keys[8], (B, N_NODES, N_NODES)) > 0.5
               ).astype(jnp.float32)
    cpt_inputs = jax.random.randint(keys[9], (B, S), 0, SRC_V)
    dec_inputs = jax.random.randint(keys[10], (B, T1), 0, TGT_V)
    probs = jax.random.uniform(keys[11], (B, S, K), jnp.float32)
    idxes = jax.random.randint(keys[12], (B, S, K), 0, TGT_V)

    fwd = jax.jit(functools.partial(graph_transformer_forward, params))
    out = fwd(enc_inputs, en_adjs, cpt_inputs, dec_inputs, probs, idxes)
    jax.block_until_ready(out)
    assert out.shape == (B, T, TGT_V) and out.dtype == jnp.float32
    assert bool(jnp.all(jnp.isfinite(out)))

    # Numerical check against the pure-JAX reference head (bf16 MXU + approx
    # reciprocal in the kernel -> loose tolerance).
    ref = jax.jit(functools.partial(graph_transformer_forward, params,
                                    use_pallas=False))(
        enc_inputs, en_adjs, cpt_inputs, dec_inputs, probs, idxes)
    jax.block_until_ready(ref)
    max_diff = float(jnp.max(jnp.abs(out - ref)))
    assert max_diff < 0.1, f"kernel/reference mismatch: max|diff|={max_diff}"

    print("KERNEL_OK")
</pallas_src>

<mosaic_0001>
module attributes {stable_mosaic.version = 11 : i64} {
  func.func @_fused_head_kernel(%arg0: i32, %arg1: memref<16x32xbf16, #tpu.memory_space<vmem>>, %arg2: memref<32x128xbf16, #tpu.memory_space<vmem>>, %arg3: memref<2x8x8xbf16, #tpu.memory_space<vmem>>, %arg4: memref<2x32xi32, #tpu.memory_space<vmem>>, %arg5: memref<2x32xf32, #tpu.memory_space<vmem>>, %arg6: memref<1x32xf32, #tpu.memory_space<vmem>>, %arg7: memref<16x128xf32, #tpu.memory_space<vmem>>) attributes {dimension_semantics = [#tpu.dimension_semantics<arbitrary>], iteration_bounds = array<i64: 1>, scalar_prefetch = 0 : i64, scratch_operands = 0 : i64, tpu.core_type = #tpu.core_type<tc>, window_params = [{pipeline_mode = #tpu.pipeline_mode<synchronous>, transform_indices = @transform_0, window_bounds = array<i64: 16, 32>}, {pipeline_mode = #tpu.pipeline_mode<synchronous>, transform_indices = @transform_1, window_bounds = array<i64: 32, 128>}, {pipeline_mode = #tpu.pipeline_mode<synchronous>, transform_indices = @transform_2, window_bounds = array<i64: 2, 8, 8>}, {pipeline_mode = #tpu.pipeline_mode<synchronous>, transform_indices = @transform_3, window_bounds = array<i64: 2, 32>}, {pipeline_mode = #tpu.pipeline_mode<synchronous>, transform_indices = @transform_4, window_bounds = array<i64: 2, 32>}, {pipeline_mode = #tpu.pipeline_mode<synchronous>, transform_indices = @transform_5, window_bounds = array<i64: 1, 32>}, {pipeline_mode = #tpu.pipeline_mode<synchronous>, transform_indices = @transform_6, window_bounds = array<i64: 16, 128>}]} {
    %c0 = arith.constant 0 : index
    %c0_0 = arith.constant 0 : index
    %0 = vector.load %arg1[%c0, %c0_0] : memref<16x32xbf16, #tpu.memory_space<vmem>>, vector<16x32xbf16>
    %c0_1 = arith.constant 0 : index
    %c0_2 = arith.constant 0 : index
    %1 = vector.load %arg2[%c0_1, %c0_2] : memref<32x128xbf16, #tpu.memory_space<vmem>>, vector<32x128xbf16>
    %cst = arith.constant dense<0.000000e+00> : vector<16x128xf32>
    %2 = tpu.matmul %0, %1, %cst {dimension_numbers = #tpu.dot_dimension_numbers<[1], [0], [0], [1], [0, 0, 1, 1], [], []>} : vector<16x32xbf16>, vector<32x128xbf16>, vector<16x128xf32> -> vector<16x128xf32>
    %cst_3 = arith.constant dense<0xFF800000> : vector<16xf32>
    %3 = vector.multi_reduction <maximumf>, %2, %cst_3 [1] : vector<16x128xf32> to vector<16xf32>
    %4 = vector.shape_cast %3 : vector<16xf32> to vector<16x1xf32>
    %5 = vector.broadcast %4 : vector<16x1xf32> to vector<16x128xf32>
    %6 = arith.subf %2, %5 : vector<16x128xf32>
    %7 = math.exp %6 : vector<16x128xf32>
    %cst_4 = arith.constant dense<0.000000e+00> : vector<16xf32>
    %8 = vector.multi_reduction <add>, %7, %cst_4 [1] : vector<16x128xf32> to vector<16xf32>
    %9 = vector.shape_cast %8 : vector<16xf32> to vector<16x1xf32>
    %10 = tpu.reciprocal %9 {approx = true} : vector<16x1xf32> -> vector<16x1xf32>
    %11 = vector.broadcast %10 : vector<16x1xf32> to vector<16x128xf32>
    %12 = arith.mulf %7, %11 : vector<16x128xf32>
    %13 = arith.extf %0 : vector<16x32xbf16> to vector<16x32xf32>
    %c0_5 = arith.constant 0 : index
    %c0_6 = arith.constant 0 : index
    %14 = vector.load %arg6[%c0_5, %c0_6] : memref<1x32xf32, #tpu.memory_space<vmem>>, vector<1x32xf32>
    %15 = vector.broadcast %14 : vector<1x32xf32> to vector<16x32xf32>
    %16 = arith.mulf %13, %15 : vector<16x32xf32>
    %cst_7 = arith.constant dense<0.000000e+00> : vector<16xf32>
    %17 = vector.multi_reduction <add>, %16, %cst_7 [1] : vector<16x32xf32> to vector<16xf32>
    %18 = vector.shape_cast %17 : vector<16xf32> to vector<16x1xf32>
    %cst_8 = arith.constant 0.000000e+00 : f32
    %19 = vector.broadcast %cst_8 : f32 to vector<16x1xf32>
    %20 = arith.subf %19, %18 : vector<16x1xf32>
    %21 = math.exp %20 : vector<16x1xf32>
    %cst_9 = arith.constant 1.000000e+00 : f32
    %22 = vector.broadcast %cst_9 : f32 to vector<16x1xf32>
    %23 = arith.addf %22, %21 : vector<16x1xf32>
    %cst_10 = arith.constant 1.000000e+00 : f32
    %24 = vector.broadcast %cst_10 : f32 to vector<16x1xf32>
    %25 = arith.divf %24, %23 : vector<16x1xf32>
    %c0_11 = arith.constant 0 : index
    %c0_12 = arith.constant 0 : index
    %c0_13 = arith.constant 0 : index
    %26 = vector.load %arg3[%c0_11, %c0_12, %c0_13] : memref<2x8x8xbf16, #tpu.memory_space<vmem>>, vector<2x8x8xbf16>
    %27 = arith.extf %26 : vector<2x8x8xbf16> to vector<2x8x8xf32>
    %28 = tpu.concatenate %27, %27, %27, %27 in 2 : vector<2x8x8xf32>, vector<2x8x8xf32>, vector<2x8x8xf32>, vector<2x8x8xf32> -> vector<2x8x32xf32>
    %c0_14 = arith.constant 0 : index
    %c0_15 = arith.constant 0 : index
    %29 = vector.load %arg5[%c0_14, %c0_15] : memref<2x32xf32, #tpu.memory_space<vmem>>, vector<2x32xf32>
    %30 = vector.shape_cast %29 : vector<2x32xf32> to vector<2x1x32xf32>
    %31 = vector.broadcast %30 : vector<2x1x32xf32> to vector<2x8x32xf32>
    %32 = arith.mulf %28, %31 : vector<2x8x32xf32>
    %33 = arith.truncf %32 : vector<2x8x32xf32> to vector<2x8x32xbf16>
    %34 = tpu.iota {dimensions = array<i32: 2>} : vector<2x32x128xi32>
    %c0_16 = arith.constant 0 : index
    %c0_17 = arith.constant 0 : index
    %35 = vector.load %arg4[%c0_16, %c0_17] : memref<2x32xi32, #tpu.memory_space<vmem>>, vector<2x32xi32>
    %36 = vector.shape_cast %35 : vector<2x32xi32> to vector<2x32x1xi32>
    %37 = vector.broadcast %36 : vector<2x32x1xi32> to vector<2x32x128xi32>
    %38 = arith.cmpi eq, %34, %37 : vector<2x32x128xi32>
    %39 = arith.extui %38 : vector<2x32x128xi1> to vector<2x32x128xi32>
    %40 = arith.sitofp %39 : vector<2x32x128xi32> to vector<2x32x128xf32>
    %41 = arith.truncf %40 : vector<2x32x128xf32> to vector<2x32x128xbf16>
    "tpu.trace_start"() <{level = 10 : i32, message = "btx,bxv->btv"}> : () -> ()
    %cst_18 = arith.constant dense<0.000000e+00> : vector<2x8x128xf32>
    %42 = tpu.matmul %33, %41, %cst_18 {dimension_numbers = #tpu.dot_dimension_numbers<[2], [1], [1], [2], [0, 0, 0, 1, 1, 2], [0], [0]>} : vector<2x8x32xbf16>, vector<2x32x128xbf16>, vector<2x8x128xf32> -> vector<2x8x128xf32>
    "tpu.trace_stop"() : () -> ()
    %43 = vector.shape_cast %42 : vector<2x8x128xf32> to vector<16x128xf32>
    %44 = vector.broadcast %25 : vector<16x1xf32> to vector<16x128xf32>
    %45 = arith.mulf %44, %43 : vector<16x128xf32>
    %cst_19 = arith.constant 1.000000e+00 : f32
    %46 = vector.broadcast %cst_19 : f32 to vector<16x1xf32>
    %47 = arith.subf %46, %25 : vector<16x1xf32>
    %48 = vector.broadcast %47 : vector<16x1xf32> to vector<16x128xf32>
    %49 = arith.mulf %48, %12 : vector<16x128xf32>
    %50 = arith.addf %45, %49 : vector<16x128xf32>
    %cst_20 = arith.constant 9.99999996E-13 : f32
    %51 = vector.broadcast %cst_20 : f32 to vector<16x128xf32>
    %52 = arith.addf %50, %51 : vector<16x128xf32>
    %53 = math.log %52 : vector<16x128xf32>
    %c0_21 = arith.constant 0 : index
    %c0_22 = arith.constant 0 : index
    %54 = vector.load %arg7[%c0_21, %c0_22] : memref<16x128xf32, #tpu.memory_space<vmem>>, vector<16x128xf32>
    tpu.vector_store %arg7[%c0_21, %c0_22], %53 {strides = array<i32>} : memref<16x128xf32, #tpu.memory_space<vmem>>, vector<16x128xf32>,
    return
  }
  func.func @transform_0(%arg0: i32) -> (i32, i32) {
    %c0_i32 = arith.constant 0 : i32
    %c0_i32_0 = arith.constant 0 : i32
    %c0_i32_1 = arith.constant 0 : i32
    return %c0_i32, %c0_i32_0 : i32, i32
  }
  func.func @transform_1(%arg0: i32) -> (i32, i32) {
    %c0_i32 = arith.constant 0 : i32
    %c0_i32_0 = arith.constant 0 : i32
    %c0_i32_1 = arith.constant 0 : i32
    return %c0_i32, %c0_i32_0 : i32, i32
  }
  func.func @transform_2(%arg0: i32) -> (i32, i32, i32) {
    %c0_i32 = arith.constant 0 : i32
    %c0_i32_0 = arith.constant 0 : i32
    %c0_i32_1 = arith.constant 0 : i32
    %c0_i32_2 = arith.constant 0 : i32
    return %c0_i32, %c0_i32_0, %c0_i32_1 : i32, i32, i32
  }
  func.func @transform_3(%arg0: i32) -> (i32, i32) {
    %c0_i32 = arith.constant 0 : i32
    %c0_i32_0 = arith.constant 0 : i32
    %c0_i32_1 = arith.constant 0 : i32
    return %c0_i32, %c0_i32_0 : i32, i32
  }
  func.func @transform_4(%arg0: i32) -> (i32, i32) {
    %c0_i32 = arith.constant 0 : i32
    %c0_i32_0 = arith.constant 0 : i32
    %c0_i32_1 = arith.constant 0 : i32
    return %c0_i32, %c0_i32_0 : i32, i32
  }
  func.func @transform_5(%arg0: i32) -> (i32, i32) {
    %c0_i32 = arith.constant 0 : i32
    %c0_i32_0 = arith.constant 0 : i32
    %c0_i32_1 = arith.constant 0 : i32
    return %c0_i32, %c0_i32_0 : i32, i32
  }
  func.func @transform_6(%arg0: i32) -> (i32, i32) {
    %c0_i32 = arith.constant 0 : i32
    %c0_i32_0 = arith.constant 0 : i32
    %c0_i32_1 = arith.constant 0 : i32
    return %c0_i32, %c0_i32_0 : i32, i32
  }
}

</mosaic_0001>

<bundles_post_ra>
// kernel: graph_transformer_forward.1
= control target key start
LH: loop header
LB: loop body
LE: loop exit
PB: predicated region body
PF: predicated region fallthrough
CT: control target
= control target key end

     0   :  { %v180_v1 = vlaneseq  ;;  %s570_s0 = inlined_call_operand.vmem [shape: bf16[16,32], index: 0, kind: input, shape index: {}]   ;;  %s571_s1 = inlined_call_operand.vmem [shape: bf16[32,128], index: 1, kind: input, shape index: {}]   ;;  %s572_s2 = inlined_call_operand.vmem [shape: bf16[2,8,8], index: 2, kind: input, shape index: {}]   ;;  %s573_s3 = inlined_call_operand.vmem [shape: s32[2,32], index: 3, kind: input, shape index: {}]   ;;  %s574_s4 = inlined_call_operand.vmem [shape: f32[2,32], index: 4, kind: input, shape index: {}]   ;;  %s575_s5 = inlined_call_operand.vmem [shape: f32[1,32], index: 5, kind: input, shape index: {}]   ;;  %s576_s6 = inlined_call_operand.hbm [shape: f32[16,128], index: 6, kind: output, shape index: {}]  }
   0x1   :  { %v380_v0 = vld [vmem:[%s571_s1 + $0x8] sm:$0xff]  ;;  %v379_v2 = vld [vmem:[%s571_s1] sm:$0xff] }
   0x2   :  { %58 = vmatpush.bf16.msra.mxu0 %v380_v0  ;;  %v185_v3 = vshrl.u32 %v180_v1, 7 }
   0x3   :  { %11 = vsyncpa [#allocation3], 0  ;;  %v378_v5 = vld [vmem:[%s570_s0] sm:$0xff]  ;;  %vm48_vm0 = vcmask 261120   ;;  %s452_s30 = smov 24   ;;  %s453_s7 = smov 16  }
   0x4   :  { %393 = vset.pattern.permute.xlu1 %v185_v3  ;;  %v198_v4 = vadd.s32 16, %v185_v3  ;;  %v182_v6 = vld [vmem:[%s573_s3] sm:$0x3]  ;;  %v192_v9 = vadd.s32 8, %v185_v3  ;;  %v204_v10 = vadd.s32 24, %v185_v3  ;;  %s451_s3 = smov 8  }
   0x5   :  { %v208_v7 = vperm.slane %v182_v6, 1  ;;  %v183_v8 = vperm.slane %v182_v6, 0  ;;  %v382_v11 = vld [vmem:[%s572_s2] sm:$0xff]   ;;  %v519_v15 = vand.u32 127, %v180_v1  ;;  %v454_v17 = vmov 0.0   ;;  %s343_s14 = sshll.u32 %s576_s6, 4  ;;  %s344_s14 = int_to_ptr.hbm [resolvable:$true] %s343_s14 }
   0x6   :  { %59 = vmatpush.bf16.msra.mxu0 %v379_v2  ;;  %391 = vset.pattern.permute.xlu0 %v198_v4  ;;  %v508_v12 = vunpack.c.l.bf16 %v382_v11  ;;  %v510_v13 = vunpack.c.h.bf16 %v382_v11  ;;  %v26_v26 = vld [vmem:[%s570_s0] sm:$0xff]   ;;  %vm160_vm7 = vcmask 64512   ;;  %vm163_vm8 = vcmask 130048   ;;  %s456_s15 = smov 128  }
   0x7   :  { %400 = vset.pattern.permute.xlu2 %v198_v4  ;;  %v85_v28 = vunpack.c.h.bf16 %v26_v26  ;;  %v404_v29 = vld [vmem:[%s575_s5] ss:$0 sm:$0xff]  ;;  %v84_v33 = vunpack.c.l.bf16 %v26_v26  ;;  %vm166_vm9 = vcmask 195584  }
   0x8   :  { %v395_v14 = vpack.i.bf16 %v508_v12, %v510_v13  ;;  %v169_v47 = vld [vmem:[%s574_s4] sm:$0x3]  ;;  %s455_s4 = smov [#allocation2]  }
   0x9   :  { %367 = vmatmul.msk.bf16.vlgmr.msra.gmra.mxu0 %vm48_vm0, %v378_v5  ;;  %v91_v32 = vmul.f32 %v404_v29, %v85_v28  ;;  %v90_v34 = vmul.f32 %v404_v29, %v84_v33  ;;  %v171_v51 = vrot.slane %v169_v47, 1  ;;  %s341_s11 = sshll.u32 %s455_s4, 4  ;;  %s342_s11 = int_to_ptr.vmem [resolvable:$true] %s341_s11 }
   0xb   :  { %v95_v36 = vsel %vm48_vm0, %v91_v32, 0.0  ;;  %v92_v37 = vsel %vm48_vm0, %v90_v34, 0.0  ;;  %v173_v59 = vperm.slane %v171_v51, 0 }
   0xc   :  { %213 = vperm.xlu1 %393, %v208_v7  }
   0xe   :  { %225 = vperm.xlu0 %391, %v208_v7  }
   0xf   :  { %200 = vperm.xlu2 %400, %v183_v8  }
  0x14   :  { %394 = vset.pattern.permute.xlu1 %v192_v9 }
  0x16   :  { %392 = vset.pattern.permute.xlu0 %v204_v10 }
  0x17   :  { %401 = vset.pattern.permute.xlu2 %v204_v10 }
  0x1c   :  { %219 = vperm.xlu1 %394, %v208_v7  }
  0x1e   :  { %231 = vperm.xlu0 %392, %v208_v7  }
  0x1f   :  { %206 = vperm.xlu2 %401, %v183_v8  }
  0x24   :  { %396 = vrot.lane.b32.xlu1 %v395_v14, %s451_s3 }
  0x25   :  { %402 = vset.pattern.permute.xlu1 %v185_v3 }
  0x26   :  { %156 = vrot.lane.b32.xlu0 %v510_v13, %s452_s30 }
  0x27   :  { %403 = vset.pattern.permute.xlu2 %v192_v9 }
  0x28   :  { %150 = vrot.lane.b32.xlu2 %v510_v13, %s453_s7 }
  0x2d   :  { %188 = vperm.xlu1 %402, %v183_v8  }
  0x2e   :  { %148 = vrot.lane.b32.xlu0 %v508_v12, %s453_s7 }
  0x30   :  { %194 = vperm.xlu2 %403, %v183_v8  }
  0x35   :  { %154 = vrot.lane.b32.xlu1 %v508_v12, %s452_s30 }
  0x5f   :  { %93 = vadd.xlane.f32.xlu1 %v92_v37 }
  0x69   :  { %v201_v16 = vpop.permute.xlu2 %200 }
  0x6a   :  { %vm235_vm1 = vcmp.eq.s32.totalorder %v519_v15, %v201_v16  ;;  %v172_v16 = vperm.slane %v169_v47, 0 }
  0x6b   :  { %v370_v18 = vsel %vm235_vm1, 1.0, %v454_v17 }
  0x6c   :  { %v259_v19 = vpack.c.bf16 %v370_v18, %v370_v18 }
  0x6e   :  { %v271_v23 = vunpack.c.l.b16 %v259_v19 }
  0x79   :  { %v207_v20 = vpop.permute.xlu2 %206 }
  0x7a   :  { %vm236_vm2 = vcmp.eq.s32.totalorder %v519_v15, %v207_v20 }
  0x7b   :  { %v371_v21 = vsel %vm236_vm2, 1.0, %v454_v17 }
  0x7c   :  { %v260_v22 = vpack.c.bf16 %v371_v21, %v371_v21 }
  0x7e   :  { %v272_v24 = vunpack.c.l.b16 %v260_v22  ;;  %v214_v27 = vpop.permute.xlu1 %213 }
  0x7f   :  { %vm237_vm4 = vcmp.eq.s32.totalorder %v519_v15, %v214_v27 }
  0x80   :  { %v274_v25 = vpack.c.b16 %v272_v24, %v271_v23  ;;  %v226_v31 = vpop.permute.xlu0 %225  ;;  %v372_v40 = vsel %vm237_vm4, 1.0, %v454_v17 }
  0x81   :  { %vm239_vm3 = vcmp.eq.s32.totalorder %v519_v15, %v226_v31  ;;  %v261_v45 = vpack.c.bf16 %v372_v40, %v372_v40 }
  0x82   :  { %286 = vmatpush.bf16.msra.mxu1 %v274_v25  ;;  %v374_v35 = vsel %vm239_vm3, 1.0, %v454_v17  ;;  %v151_v38 = vpop.permute.xlu2 %150 }
  0x83   :  { %v263_v42 = vpack.c.bf16 %v374_v35, %v374_v35  ;;  %v297_v52 = vunpack.c.l.b16 %v261_v45 }
  0x85   :  { %v299_v50 = vunpack.c.l.b16 %v263_v42 }
  0x86   :  { %v531_v30 = vpop.f32.mrf.mxu0 }
  0x87   :  { %66 = vmax.xlane.f32.xlu2 %v531_v30 }
  0x8a   :  { %v195_v55 = vpop.permute.xlu2 %194 }
  0x8b   :  { %vm234_vm10 = vcmp.eq.s32.totalorder %v519_v15, %v195_v55 }
  0x8c   :  { %v369_v1 = vsel %vm234_vm10, 1.0, %v454_v17 }
  0x8d   :  { %v258_v5 = vpack.c.bf16 %v369_v1, %v369_v1 }
  0x8e   :  { %v539_v39 = vpop.f32.mrf.mxu0  ;;  %v220_v41 = vpop.permute.xlu1 %219 }
  0x8f   :  { %68 = vmax.xlane.f32.xlu0 %v539_v39  ;;  %vm238_vm5 = vcmp.eq.s32.totalorder %v519_v15, %v220_v41  ;;  %96 = vadd.xlane.f32.xlu2 %v95_v36  ;;  %v270_v8 = vunpack.c.l.b16 %v258_v5 }
  0x90   :  { %v373_v43 = vsel %vm238_vm5, 1.0, %v454_v17  ;;  %v232_v44 = vpop.permute.xlu0 %231 }
  0x91   :  { %v262_v46 = vpack.c.bf16 %v373_v43, %v373_v43  ;;  %vm240_vm6 = vcmp.eq.s32.totalorder %v519_v15, %v232_v44 }
  0x92   :  { %v375_v48 = vsel %vm240_vm6, 1.0, %v454_v17 }
  0x93   :  { %v264_v49 = vpack.c.bf16 %v375_v48, %v375_v48  ;;  %v298_v53 = vunpack.c.l.b16 %v262_v46 }
  0x95   :  { %v300_v54 = vunpack.c.l.b16 %v264_v49  ;;  %v301_v62 = vpack.c.b16 %v298_v53, %v297_v52 }
  0x96   :  { %v397_v56 = vpop.permute.xlu1 %396 }
  0x97   :  { %v398_v57 = vunpack.i.l.bf16 %v397_v56  ;;  %v302_v58 = vpack.c.b16 %v300_v54, %v299_v50  ;;  %v399_v3 = vunpack.i.h.bf16 %v397_v56 }
  0x98   :  { %v157_v60 = vpop.permute.xlu0 %156 }
  0x99   :  { %314 = vmatpush.bf16.msra.mxu2 %v302_v58  ;;  %v162_v61 = vsel %vm160_vm7, %v510_v13, %v398_v57  ;;  %v161_v11 = vsel %vm160_vm7, %v508_v12, %v399_v3 }
  0x9a   :  { %v165_v63 = vsel %vm163_vm8, %v162_v61, %v151_v38 }
  0x9b   :  { %v168_v0 = vsel %vm166_vm9, %v165_v63, %v157_v60 }
  0x9c   :  { %v177_v2 = vmul.f32 %v173_v59, %v168_v0 }
  0x9d   :  { %315 = vmatpush.bf16.msra.mxu2 %v301_v62 }
  0x9e   :  { %v179_v4 = vpack.c.bf16 %v177_v2, %v177_v2 }
  0x9f   :  { %v189_v6 = vpop.permute.xlu1 %188 }
  0xa0   :  { %377 = vmatmul.msk.bf16.vlgmr.msra.gmra.mxu2 %vm48_vm0, %v179_v4  ;;  %vm233_vm11 = vcmp.eq.s32.totalorder %v519_v15, %v189_v6  ;;  %v149_v10 = vpop.permute.xlu0 %148 }
  0xa1   :  { %v368_v7 = vsel %vm233_vm11, 1.0, %v454_v17  ;;  %v164_v14 = vsel %vm163_vm8, %v161_v11, %v149_v10 }
  0xa2   :  { %v257_v9 = vpack.c.bf16 %v368_v7, %v368_v7 }
  0xa4   :  { %v269_v13 = vunpack.c.l.b16 %v257_v9 }
  0xa6   :  { %v273_v18 = vpack.c.b16 %v270_v8, %v269_v13 }
  0xa7   :  { %v155_v19 = vpop.permute.xlu1 %154 }
  0xa8   :  { %287 = vmatpush.bf16.msra.mxu1 %v273_v18  ;;  %v167_v20 = vsel %vm166_vm9, %v164_v14, %v155_v19 }
  0xa9   :  { %v176_v21 = vmul.f32 %v172_v16, %v167_v20 }
  0xab   :  { %v178_v22 = vpack.c.bf16 %v176_v21, %v176_v21 }
  0xad   :  { %376 = vmatmul.msk.bf16.vlgmr.msra.gmra.mxu1 %vm48_vm0, %v178_v22 }
  0xd2   :  { %v94_v33 = vpop.xlane.xlu1 %93 }
  0xd3   :  { %v98_v34 = vsub.f32 0.0, %v94_v33 }
  0xd5   :  { %v100_v35 = vmul.f32 1.442695, %v98_v34 }
  0xfa   :  { %v67_v15 = vpop.xlane.xlu2 %66 }
  0xfb   :  { %v70_v17 = vsub.f32 %v531_v30, %v67_v15 }
  0xfd   :  { %v72_v23 = vmul.f32 1.442695, %v70_v17 }
  0xff   :  { %405 = vpow2.f32 %v72_v23 }
 0x102   :  { %v69_v24 = vpop.xlane.xlu0 %68  ;;  %v97_v36 = vpop.xlane.xlu2 %96 }
 0x103   :  { %v71_v12 = vsub.f32 %v539_v39, %v69_v24  ;;  %v99_v30 = vsub.f32 0.0, %v97_v36 }
 0x105   :  { %v406_v25 = vpop.eup %405  ;;  %v74_v26 = vmul.f32 1.442695, %v71_v12  ;;  %v102_v37 = vmul.f32 1.442695, %v99_v30 }
 0x106   :  { %76 = vadd.xlane.f32.xlu2 %v406_v25 }
 0x107   :  { %407 = vpow2.f32 %v74_v26 }
 0x108   :  { %409 = vpow2.f32 %v100_v35 }
 0x109   :  { %411 = vpow2.f32 %v102_v37 }
 0x10d   :  { %v408_v27 = vpop.eup %407 }
 0x10e   :  { %78 = vadd.xlane.f32.xlu0 %v408_v27  ;;  %v410_v38 = vpop.eup %409 }
 0x10f   :  { %v104_v39 = vadd.f32 1.0, %v410_v38  ;;  %v412_v40 = vpop.eup %411 }
 0x110   :  { %v105_v41 = vadd.f32 1.0, %v412_v40 }
 0x111   :  { %413 = vrcp.f32 %v104_v39  ;;  %vm111_vm12 = vweird.f32 %v104_v39  ;;  %v117_v48 = vand.u32 2147483648, %v104_v39  ;;  %v115_v51 = vand.u32 2147483647, %v104_v39 }
 0x112   :  { %415 = vrcp.f32 %v105_v41  ;;  %vm126_vm0 = vweird.f32 %v105_v41  ;;  %v132_v57 = vand.u32 2147483648, %v105_v41  ;;  %v130_v60 = vand.u32 2147483647, %v105_v41 }
 0x113   :  { %v118_v53 = vor.u32 1.1754944e-38, %v117_v48  ;;  %vm116_vm15 = vcmp.eq.f32.partialorder %v115_v51, 8.507059e+37 }
 0x114   :  { %v133_v2 = vor.u32 1.1754944e-38, %v132_v57  ;;  %vm131_vm3 = vcmp.eq.f32.partialorder %v130_v60, 8.507059e+37 }
 0x117   :  { %v414_v42 = vpop.eup %413 }
 0x118   :  { %v107_v43 = vmul.f32 %v414_v42, %v104_v39  ;;  %v416_v45 = vpop.eup %415  ;;  %vm112_vm13 = vweird.f32 %v414_v42 }
 0x119   :  { %v122_v46 = vmul.f32 %v416_v45, %v105_v41  ;;  %vm113_vm14 = vmor %vm111_vm12, %vm112_vm13  ;;  %vm127_vm1 = vweird.f32 %v416_v45 }
 0x11a   :  { %v108_v44 = vsub.f32 1.0, %v107_v43  ;;  %vm128_vm2 = vmor %vm126_vm0, %vm127_vm1 }
 0x11b   :  { %v123_v49 = vsub.f32 1.0, %v122_v46 }
 0x11c   :  { %v109_v47 = vmul.f32 %v414_v42, %v108_v44 }
 0x11d   :  { %v124_v54 = vmul.f32 %v416_v45, %v123_v49 }
 0x11e   :  { %v110_v50 = vadd.f32 %v414_v42, %v109_v47 }
 0x11f   :  { %v125_v59 = vadd.f32 %v416_v45, %v124_v54 }
 0x120   :  { %v114_v55 = vsel %vm113_vm14, %v414_v42, %v110_v50 }
 0x121   :  { %v119_v58 = vsel %vm116_vm15, %v118_v53, %v114_v55  ;;  %v129_v3 = vsel %vm128_vm2, %v416_v45, %v125_v59 }
 0x122   :  { %v323_v61 = vsub.f32 1.0, %v119_v58  ;;  %v134_v7 = vsel %vm131_vm3, %v133_v2, %v129_v3 }
 0x123   :  { %v317_v28 = vpop.f32.mrf.mxu2  ;;  %v324_v8 = vsub.f32 1.0, %v134_v7 }
 0x124   :  { %v322_v10 = vmul.f32 %v317_v28, %v134_v7 }
 0x12a   :  { %v289_v29 = vpop.f32.mrf.mxu1 }
 0x12b   :  { %v319_v31 = vpop.f32.mrf.mxu2  ;;  %v321_v0 = vmul.f32 %v289_v29, %v119_v58 }
 0x132   :  { %v291_v32 = vpop.f32.mrf.mxu1 }
 0x179   :  { %v77_v52 = vpop.xlane.xlu2 %76 }
 0x17a   :  { %417 = vrcp.f32 %v77_v52 }
 0x180   :  { %v418_v56 = vpop.eup %417 }
 0x181   :  { %v82_v62 = vmul.f32 %v418_v56, %v406_v25  ;;  %v79_v63 = vpop.xlane.xlu0 %78 }
 0x182   :  { %419 = vrcp.f32 %v79_v63 }
 0x183   :  { %v325_v1 = vmul.f32 %v323_v61, %v82_v62 }
 0x185   :  { %v327_v4 = vadd.f32 %v325_v1, %v321_v0 }
 0x187   :  { %v329_v5 = vadd.f32 1e-12, %v327_v4 }
 0x188   :  { %v420_v6 = vpop.eup %419 }
 0x189   :  { %421 = vlog2.f32 %v329_v5  ;;  %v83_v9 = vmul.f32 %v420_v6, %v408_v27 }
 0x18b   :  { %v326_v11 = vmul.f32 %v324_v8, %v83_v9 }
 0x18d   :  { %v328_v13 = vadd.f32 %v326_v11, %v322_v10 }
 0x18f   :  { %v422_v14 = vpop.eup %421  ;;  %v330_v16 = vadd.f32 1e-12, %v328_v13 }
 0x190   :  { %v332_v18 = vmul.f32 0.6931472, %v422_v14 }
 0x191   :  { %423 = vlog2.f32 %v330_v16 }
 0x192   :  { %335 = vst [vmem:[#allocation2] sm:$0xff] %v332_v18 }
 0x197   :  { %v424_v19 = vpop.eup %423 }
 0x198   :  { %v334_v20 = vmul.f32 0.6931472, %v424_v19 }
 0x19a   :  { %336 = vst [vmem:[#allocation2 + $0x8] sm:$0xff] %v334_v20 }
 0x19b   :  { %349 = dma.vmem_to_hbm [thread:$0]  %s342_s11, 256, %s344_s14, [#allocation3], %s456_s15, %s456_s15, %s451_s3  }
 0x19c   :  { %449 = dma.done.wait [#allocation3], 256  }
 0x19d   :  { %450 = vsyncadd [#allocation3], 4294967040 }
 0x19e   :  { %354 = vsyncpa [#allocation3], 1 }

</bundles_post_ra>
